<compile_context>
chip_gen: v7x
topology: tpu7x:2x2x1
jax: 0.10.0
libtpu: 0.0.40
codegen_flags: <defaults>
</compile_context>

<pallas_src>
import functools

import jax
import jax.numpy as jnp
from jax.experimental import pallas as pl
from jax.experimental.pallas import tpu as pltpu


_MAX_BLOCK_ROWS = 512                 # sublane-dim tile cap
_MAX_BLOCK_TIME = 4096                # lane-dim tile cap (t=16000 -> bt=3200)
_VMEM_BUDGET = 16 * 1024 * 1024       # double-buffered working-set target
_VMEM_LIMIT = 32 * 1024 * 1024        # explicit scoped-VMEM limit (all gens)


def _sublane_align(dtype) -> int:
    # 8 sublanes for 32-bit, 16 for 16-bit, 32 for 8-bit dtypes.
    return max(8, 32 // jnp.dtype(dtype).itemsize)


def _round_up(x: int, m: int) -> int:
    return -(-x // m) * m


def _pick_time_block(t: int, cap: int) -> int:
    """Largest multiple of 128 dividing t (t must be 128-aligned), <= cap.
    Downward scan from the cap: O(cap/128) trace-time iterations."""
    b = max(128, (min(t, cap) // 128) * 128)
    while b > 128:
        if t % b == 0:
            return b
        b -= 128
    return 128


def _pick_row_block(lead: int, align: int, cap: int) -> int:
    """Row (sublane-dim) block size. Always respects the VMEM-derived cap; for
    leading dims that are not a multiple of the sublane alignment the grid uses
    a partial trailing block (cdiv) instead of one giant full-lead block."""
    if lead <= align:
        return max(1, lead)                         # full dim; exempt from (8,128)
    cap_aligned = max(align, (min(cap, lead) // align) * align)
    if lead % align != 0:
        # Aligned block <= lead; trailing partial block handled by cdiv grid.
        return min(cap_aligned, (lead // align) * align)
    best = align
    b = cap_aligned
    while b >= align:                               # O(cap/align) downward scan
        if lead % b == 0:
            best = b
            break
        b -= align
    rows = lead // best
    if rows > 1 and rows % 2 == 1:
        # Mild megacore (v7x) preference: even row-grid split if it costs <= 2x.
        b = best - align
        while b >= align and 2 * b >= best:
            if lead % b == 0 and (lead // b) % 2 == 0:
                return b
            b -= align
    return best


# ---------------------------------------------------------------------------
# Kernels
# ---------------------------------------------------------------------------

def _copy_kernel(x_ref, o_ref):
    """Truncate path: copy the leading prefix of the (possibly wider) block."""
    o_ref[...] = x_ref[:, : o_ref.shape[-1]]


def _pad_tiled_kernel(x_ref, o_ref, *, cur_len: int, bt: int):
    """Pad path, lane-aligned tiling (cur_len >= bt): copy / zero / boundary."""
    j = pl.program_id(1)
    start = j * bt
    end = start + bt

    @pl.when(end <= cur_len)          # block fully inside the valid prefix
    def _():
        o_ref[...] = x_ref[...]

    @pl.when(start >= cur_len)        # block fully in the zero-padding region
    def _():
        o_ref[...] = jnp.zeros(o_ref.shape, o_ref.dtype)

    @pl.when(jnp.logical_and(start < cur_len, end > cur_len))   # boundary block
    def _():
        col = start + jax.lax.broadcasted_iota(jnp.int32, o_ref.shape, 1)
        o_ref[...] = jnp.where(col < cur_len, x_ref[...],
                               jnp.zeros(o_ref.shape, o_ref.dtype))


def _pad_narrow_kernel(x_ref, o_ref, *, cur_len: int):
    """Pad path, lane-aligned tiling but input narrower than one time block
    (cur_len < bt): only block j==0 holds data, the rest are zeros.  The valid
    prefix and the zero suffix are each stored exactly once."""
    j = pl.program_id(1)
    rows, bt = o_ref.shape

    @pl.when(j == 0)
    def _():
        o_ref[:, :cur_len] = x_ref[...]
        o_ref[:, cur_len:] = jnp.zeros((rows, bt - cur_len), o_ref.dtype)

    @pl.when(j != 0)
    def _():
        o_ref[...] = jnp.zeros(o_ref.shape, o_ref.dtype)


def _pad_full_kernel(x_ref, o_ref, *, cur_len: int):
    """Fallback pad path (target not 128-lane aligned): one full-width block;
    prefix copy + suffix zeros, no double write."""
    rows, t = o_ref.shape
    o_ref[:, :cur_len] = x_ref[...]
    o_ref[:, cur_len:] = jnp.zeros((rows, t - cur_len), o_ref.dtype)


# ---------------------------------------------------------------------------
# Wrapper
# ---------------------------------------------------------------------------

def pad_waveform(waveform: jax.Array, target_length: int) -> jax.Array:
    """Pad with zeros or truncate `waveform` along its last axis to
    `target_length` (PadWaveform.forward semantics)."""
    # TODO(synk): lengths are baked in statically, so each distinct
    # (cur_len, target_length) pair costs one Mosaic recompile; use
    # PrefetchScalarGridSpec scalar lengths if runtime-ragged lengths matter.
    orig_shape = waveform.shape
    cur_len = int(orig_shape[-1])
    t = int(target_length)
    lead = 1
    for d in orig_shape[:-1]:
        lead *= int(d)

    dtype = waveform.dtype
    itemsize = jnp.dtype(dtype).itemsize

    # Trivial cases: identity length (no HBM round trip) and degenerate shapes.
    if cur_len == t:
        return waveform
    if lead == 0 or t == 0 or cur_len == 0:
        return jnp.zeros(orig_shape[:-1] + (t,), dtype)

    x2d = waveform.reshape(lead, cur_len)

    lane_aligned = (t % 128 == 0)
    bt = _pick_time_block(t, _MAX_BLOCK_TIME) if lane_aligned else t

    # Width of the input block actually brought into VMEM.
    if cur_len >= t:
        if lane_aligned:
            in_width = bt
        else:
            # Read only the 128-rounded prefix, not the whole cur_len row.
            in_width = min(cur_len, _round_up(t, 128))
    else:
        in_width = bt if (lane_aligned and cur_len >= bt) else cur_len

    # Row tile: keep the double-buffered working set near the VMEM budget.
    per_row_bytes = 2 * (in_width + bt) * itemsize
    row_cap = max(1, min(_MAX_BLOCK_ROWS, _VMEM_BUDGET // max(1, per_row_bytes)))
    align = _sublane_align(dtype)
    br = _pick_row_block(lead, align, row_cap)

    grid_rows = -(-lead // br)
    grid_time = (t // bt) if lane_aligned else 1
    grid = (grid_rows, grid_time)

    out_spec = pl.BlockSpec((br, bt), lambda i, j: (i, j))
    out_shape = jax.ShapeDtypeStruct((lead, t), dtype)

    if cur_len >= t:
        # ----- truncate: stream only the (rounded) leading columns. -----
        read_bytes = lead * in_width * itemsize
        if lane_aligned:
            in_spec = pl.BlockSpec((br, bt), lambda i, j: (i, j))
        else:
            in_spec = pl.BlockSpec((br, in_width), lambda i, j: (i, 0))
        kernel = _copy_kernel
    else:
        # ----- pad with trailing zeros. -----
        read_bytes = lead * cur_len * itemsize
        if lane_aligned and cur_len >= bt:
            jmax = (cur_len + bt - 1) // bt - 1   # last input time block with data
            in_spec = pl.BlockSpec(
                (br, bt), lambda i, j, jmax=jmax: (i, jnp.minimum(j, jmax)))
            kernel = functools.partial(_pad_tiled_kernel, cur_len=cur_len, bt=bt)
        elif lane_aligned:
            # Input narrower than one time block: keep it resident across j.
            in_spec = pl.BlockSpec((br, cur_len), lambda i, j: (i, 0))
            kernel = functools.partial(_pad_narrow_kernel, cur_len=cur_len)
        else:
            in_spec = pl.BlockSpec((br, cur_len), lambda i, j: (i, 0))
            kernel = functools.partial(_pad_full_kernel, cur_len=cur_len)

    write_bytes = lead * t * itemsize
    out2d = pl.pallas_call(
        kernel,
        out_shape=out_shape,
        grid=grid,
        in_specs=[in_spec],
        out_specs=out_spec,
        compiler_params=pltpu.CompilerParams(
            dimension_semantics=("parallel", "parallel"),
            vmem_limit_bytes=_VMEM_LIMIT),
        cost_estimate=pl.CostEstimate(
            flops=0, transcendentals=0,
            bytes_accessed=read_bytes + write_bytes),
    )(x2d)

    return out2d.reshape(orig_shape[:-1] + (t,))


# ---------------------------------------------------------------------------
# Demo / correctness check
# ---------------------------------------------------------------------------

if __name__ == "__main__":
    key = jax.random.PRNGKey(0)
    k1, k2, k3, k4 = jax.random.split(key, 4)

    x_small = jax.random.normal(k1, (2, 4, 16), dtype=jnp.float32)
    x_med = jax.random.normal(k2, (2, 4, 300), dtype=jnp.float32)
    x_long = jax.random.normal(k3, (2, 4, 5000), dtype=jnp.float32)
    x_odd = jax.random.normal(k4, (3, 5, 48), dtype=jnp.float32)   # lead=15 (unaligned rows)

    def ref_pad(x, t):
        c = x.shape[-1]
        if c >= t:
            return x[..., :t]
        return jnp.pad(x, [(0, 0)] * (x.ndim - 1) + [(0, t - c)])

    # 1) Pad to the default target (tiled path, boundary block, cur_len % bt != 0).
    t = 16000
    y = jax.block_until_ready(pad_waveform(x_long, t))
    assert y.shape == (2, 4, t) and bool(jnp.allclose(y, ref_pad(x_long, t)))

    # 2) Pad, lane-aligned target, narrow-input path (cur_len < block width).
    t = 256
    y = jax.block_until_ready(pad_waveform(x_small, t))
    assert y.shape == (2, 4, t) and bool(jnp.allclose(y, ref_pad(x_small, t)))

    # 3) Pad, non-aligned target (fallback full-width block).
    t = 40
    y = jax.block_until_ready(pad_waveform(x_small, t))
    assert y.shape == (2, 4, t) and bool(jnp.allclose(y, ref_pad(x_small, t)))

    # 4) Truncate, lane-aligned target (only reads the first t columns).
    t = 256
    y = jax.block_until_ready(pad_waveform(x_long, t))
    assert y.shape == (2, 4, t) and bool(jnp.allclose(y, ref_pad(x_long, t)))

    # 5) Truncate, non-aligned target (128-rounded prefix read).
    t = 100
    y = jax.block_until_ready(pad_waveform(x_med, t))
    assert y.shape == (2, 4, t) and bool(jnp.allclose(y, ref_pad(x_med, t)))

    # 6) Identity length: returned unchanged (early return).
    t = 300
    y = jax.block_until_ready(pad_waveform(x_med, t))
    assert y.shape == (2, 4, t) and bool(jnp.allclose(y, x_med))

    # 7) Leading dims not a multiple of the sublane alignment (partial row block).
    t = 128
    y = jax.block_until_ready(pad_waveform(x_odd, t))
    assert y.shape == (3, 5, t) and bool(jnp.allclose(y, ref_pad(x_odd, t)))

    print("KERNEL_OK")
</pallas_src>

<mosaic_0001>
module attributes {stable_mosaic.version = 11 : i64} {
  func.func @_pad_tiled_kernel(%arg0: i32, %arg1: i32, %arg2: memref<8x3200xf32, #tpu.memory_space<vmem>>, %arg3: memref<8x3200xf32, #tpu.memory_space<vmem>>) attributes {dimension_semantics = [#tpu.dimension_semantics<parallel>, #tpu.dimension_semantics<parallel>], iteration_bounds = array<i64: 1, 5>, scalar_prefetch = 0 : i64, scratch_operands = 0 : i64, tpu.core_type = #tpu.core_type<tc>, window_params = [{transform_indices = @transform_0, window_bounds = array<i64: 8, 3200>}, {transform_indices = @transform_1, window_bounds = array<i64: 8, 3200>}]} {
    %c3200_i32 = arith.constant 3200 : i32
    %0 = arith.muli %arg1, %c3200_i32 : i32
    %c3200_i32_0 = arith.constant 3200 : i32
    %1 = arith.addi %0, %c3200_i32_0 : i32
    %c5000_i32 = arith.constant 5000 : i32
    %2 = arith.cmpi sle, %1, %c5000_i32 : i32
    %3 = arith.extui %2 : i1 to i32
    %c0_i32 = arith.constant 0 : i32
    %4 = arith.cmpi ne, %3, %c0_i32 : i32
    scf.if %4 {
      %c0 = arith.constant 0 : index
      %c0_6 = arith.constant 0 : index
      %13 = vector.load %arg2[%c0, %c0_6] : memref<8x3200xf32, #tpu.memory_space<vmem>>, vector<8x3200xf32>
      %c0_7 = arith.constant 0 : index
      %c0_8 = arith.constant 0 : index
      %14 = vector.load %arg3[%c0_7, %c0_8] : memref<8x3200xf32, #tpu.memory_space<vmem>>, vector<8x3200xf32>
      tpu.vector_store %arg3[%c0_7, %c0_8], %13 {strides = array<i32>} : memref<8x3200xf32, #tpu.memory_space<vmem>>, vector<8x3200xf32>,
    } else {
    }
    %c5000_i32_1 = arith.constant 5000 : i32
    %5 = arith.cmpi sge, %0, %c5000_i32_1 : i32
    %6 = arith.extui %5 : i1 to i32
    %c0_i32_2 = arith.constant 0 : i32
    %7 = arith.cmpi ne, %6, %c0_i32_2 : i32
    scf.if %7 {
      %cst = arith.constant 0.000000e+00 : f32
      %13 = vector.broadcast %cst : f32 to vector<8x3200xf32>
      %c0 = arith.constant 0 : index
      %c0_6 = arith.constant 0 : index
      %14 = vector.load %arg3[%c0, %c0_6] : memref<8x3200xf32, #tpu.memory_space<vmem>>, vector<8x3200xf32>
      tpu.vector_store %arg3[%c0, %c0_6], %13 {strides = array<i32>} : memref<8x3200xf32, #tpu.memory_space<vmem>>, vector<8x3200xf32>,
    } else {
    }
    %c5000_i32_3 = arith.constant 5000 : i32
    %8 = arith.cmpi slt, %0, %c5000_i32_3 : i32
    %c5000_i32_4 = arith.constant 5000 : i32
    %9 = arith.cmpi sgt, %1, %c5000_i32_4 : i32
    %10 = arith.andi %8, %9 : i1
    %11 = arith.extui %10 : i1 to i32
    %c0_i32_5 = arith.constant 0 : i32
    %12 = arith.cmpi ne, %11, %c0_i32_5 : i32
    scf.if %12 {
      %13 = tpu.iota {dimensions = array<i32: 1>} : vector<8x3200xi32>
      %14 = vector.broadcast %0 : i32 to vector<8x3200xi32>
      %15 = arith.addi %14, %13 : vector<8x3200xi32>
      %c5000_i32_6 = arith.constant 5000 : i32
      %16 = vector.broadcast %c5000_i32_6 : i32 to vector<8x3200xi32>
      %17 = arith.cmpi slt, %15, %16 : vector<8x3200xi32>
      %c0 = arith.constant 0 : index
      %c0_7 = arith.constant 0 : index
      %18 = vector.load %arg2[%c0, %c0_7] : memref<8x3200xf32, #tpu.memory_space<vmem>>, vector<8x3200xf32>
      %cst = arith.constant 0.000000e+00 : f32
      %19 = vector.broadcast %cst : f32 to vector<8x3200xf32>
      %20 = arith.select %17, %18, %19 : vector<8x3200xi1>, vector<8x3200xf32>
      %c0_8 = arith.constant 0 : index
      %c0_9 = arith.constant 0 : index
      %21 = vector.load %arg3[%c0_8, %c0_9] : memref<8x3200xf32, #tpu.memory_space<vmem>>, vector<8x3200xf32>
      tpu.vector_store %arg3[%c0_8, %c0_9], %20 {strides = array<i32>} : memref<8x3200xf32, #tpu.memory_space<vmem>>, vector<8x3200xf32>,
    } else {
    }
    return
  }
  func.func @transform_0(%arg0: i32, %arg1: i32) -> (i32, i32) {
    %c1_i32 = arith.constant 1 : i32
    %0 = arith.minsi %arg1, %c1_i32 : i32
    %c0_i32 = arith.constant 0 : i32
    return %arg0, %0 : i32, i32
  }
  func.func @transform_1(%arg0: i32, %arg1: i32) -> (i32, i32) {
    %c0_i32 = arith.constant 0 : i32
    return %arg0, %arg1 : i32, i32
  }
}

</mosaic_0001>

<bundles_post_ra>
// kernel: tpu_custom_call.1
= control target key start
LH: loop header
LB: loop body
LE: loop exit
PB: predicated region body
PF: predicated region fallthrough
CT: control target
= control target key end

     0   :  { %6 = vsyncpa [#allocation3], 0  ;;  %s1161_s0 = inlined_call_operand.hbm [shape: f32[8,5000], index: 0, kind: input, shape index: {}]   ;;  %s1162_s1 = inlined_call_operand.hbm [shape: f32[8,16000], index: 1, kind: output, shape index: {}]  }
   0x1   :  { %8 = vsyncpa [#allocation3 + $0x1], 0 }
   0x2   :  { %9 = vsyncpa [#allocation4], 0 }
   0x3   :  { %11 = vsyncpa [#allocation4 + $0x1], 0  ;;  %s765_s6 = smov 0   ;;  %s767_s7 = smov 0  }
   0x4   :  { %s769_s8 = smov 0   ;;  %s771_s9 = smov 0  }
   0x5   :  { %s773_s10 = smov 0   ;;  %s775_s11 = smov 0  }
   0x6   :  { %s777_s12 = smov 0   ;;  %s779_s13 = smov 0  }
   0x7   :  { %s781_s14 = smov 0  }
   0x8 LB: > { %s515_s15 = sadd.s32 4294967295, %s750_s14   ;;  %s516_s16 = sadd.s32 4294967294, %s750_s14   ;;  %s750_s14 = sphi %s781_s14, %s17_s14   ;;  %s746_s13 = sphi %s779_s13, %s1180_s13   ;;  %s742_s12 = sphi %s777_s12, %s1179_s12   ;;  %s738_s11 = sphi %s775_s11, %s1178_s11   ;;  %s734_s10 = sphi %s773_s10, %s1177_s10   ;;  %s730_s9 = sphi %s771_s9, %s1176_s9   ;;  %s726_s8 = sphi %s769_s8, %s1175_s8   ;;  %s722_s7 = sphi %s767_s7, %s1174_s7   ;;  %s718_s6 = sphi %s765_s6, %s1173_s6  }
   0x9   : > { %s26_s17 = sadd.s32 1, %s746_s13  ;;  %p33_p0 = scmp.lt.s32.totalorder %s746_s13, 1 }
   0xa   : > { %p27_p1 = scmp.ge.s32.totalorder %s26_s17, 5  ;;  %s42_s18 = sadd.s32 1, %s738_s11 }
   0xb   : > { %s814_s19 = scalar_select %p33_p0, %s746_s13, 1 }
   0xc   : > { %s1182_s17 = smov (%p27_p1, %s26_s17), 0  ;;  %p49_p2 = scmp.ne.s32.totalorder %s738_s11, %s734_s10 }
   0xd   : > { %p50_p3 = scmp.eq.s32.totalorder %s750_s14, 0  ;;  %p35_p4 = scmp.lt.s32.totalorder %s1182_s17, 1 }
   0xe   : > { %p55_p5 = scmp.ne.s32.totalorder %s734_s10, %s730_s9  ;;  %p56_p7 = scmp.eq.s32.totalorder %s515_s15, 0 }
   0xf   : > { %p823_p6 = por %p50_p3, %p49_p2  ;;  %s66_s23 = ssub.s32 %s746_s13, %s1182_s17 }
  0x10   : > { %s36_s21 = scalar_select %p35_p4, %s1182_s17, 1 }
  0x11   : > { %p828_p8 = por %p56_p7, %p55_p5  ;;  %p68_p9 = scmp.eq.s32.totalorder %s66_s23, 0 }
  0x12   : > { %s38_s24 = ssub.s32 %s814_s19, %s36_s21  ;;  %s70_s25 = sadd.s32 1, %s726_s8 }
  0x13   : > { %s1166_s22 = scalar_select %p828_p8, 1, 0 }
  0x14   : > { %p40_p10 = scmp.eq.s32.totalorder %s38_s24, 0  ;;  %p80_p11 = scmp.ne.s32.totalorder %s726_s8, %s722_s7 }
  0x15   : > { %s837_s26 = scalar_select %p68_p9, %s726_s8, %s70_s25  }
  0x16   : > { %s840_s27 = scalar_select %p40_p10, %s738_s11, %s42_s18  }
  0x17   : > { %p81_p12 = scmp.eq.s32.totalorder %s515_s15, 4  ;;  %p86_p13 = scmp.ne.s32.totalorder %s722_s7, %s718_s6 }
  0x18   : > { %p87_p0 = scmp.eq.s32.totalorder %s516_s16, 4  ;;  %p518_p3 = scmp.ge.s32.totalorder %s750_s14, 5 }
  0x19   : > { %p846_p1 = por %p81_p12, %p80_p11 }
  0x1a   : > { %p850_p2 = por %p87_p0, %p86_p13  ;;  %103 = sbr.rel (%p518_p3) target bundleno = 67 (0x43), region = 16 }
  0x1b   : > { %s1167_s28 = scalar_select %p846_p1, 1, 0 }
  0x1c   : > { %s1168_s29 = scalar_select %p850_p2, 1, 0 }
  0x21   : > { %106 = sbr.rel (!%p823_p6) target bundleno = 67 (0x43), region = 20  ;;  %s107_s30 = sand.u32 (%p823_p6), 1, %s738_s11  }
  0x22   : > { %s114_s2 = smul.u32 (%p823_p6), 25, %s814_s19  ;;  %s862_s15 = scalar_lea.sflag (%p823_p6), [#allocation3], %s107_s30 }
  0x23   : > { %s532_s3 = smul.u32 (%p823_p6), 200, %s107_s30 }
  0x24   : > { %s115_s4 = ssub.s32 (%p823_p6), 40, %s114_s2 }
  0x25   : > { %p116_p4 = scmp.lt.s32.totalorder (%p823_p6), %s115_s4, 25  ;;  %s111_s16 = scalar_lea.vmem (%p823_p6), [#allocation2], %s532_s3 }
  0x28   : > { %s1184_s4 = smov (!%p116_p4, %s115_s4), 25 }
  0x29   : > { %s859_s5 = sshll.u32 %s1184_s4, 7 }
  0x2a   : > { %s120_s9 = ssub.s32 3200, %s859_s5 }
  0x2b   : > { %121 = vsyncadd %s862_s15, %s120_s9  ;;  %p520_p5 = scmp.ne.s32.totalorder %s859_s5, 0  ;;  %s530_s18 = smul.u32 3200, %s814_s19 }
  0x2c   : > { %s129_s20 = sshll.u32 %s111_s16, 4  ;;  %s620_s19 = scalar_lea.hbm %s1161_s0, 5120  ;;  %s130_s20 = int_to_ptr.vmem [resolvable:$true] %s129_s20 }
  0x2d   : > { %s870_s24 = scalar_lea.hbm %s1161_s0, %s530_s18 }
  0x2e   : > { %s616_s25 = scalar_lea.hbm %s870_s24, %s859_s5  ;;  %p621_p10 = scmp.lt.u32.totalorder %s870_s24, %s1161_s0 }
  0x2f   : > { %p617_p6 = scmp.ne.s32.totalorder %s870_s24, %s616_s25  ;;  %p622_p11 = scmp.lt.u32.totalorder %s620_s19, %s616_s25 }
  0x30   : > { %p624_p13 = scmp.lt.u32.totalorder %s616_s25, %s870_s24 }
  0x31   : > { %p618_p7 = pnand %p617_p6, %p520_p5  ;;  %p623_p12 = por %p622_p11, %p621_p10 }
  0x33   : > { %p619_p9 = pneg %p618_p7  ;;  %p625_p0 = por %p624_p13, %p623_p12 }
  0x35   : > { %p626_p3 = pnand %p625_p0, %p619_p9 }
  0x37   : > { %629 = shalt.err (!%p626_p3)
}
  0x38   : > { %s630_s9 = scalar_lea.vmem %s130_s20, %s859_s5  ;;  %s752_s16 = smov [#allocation2]  }
  0x39   : > { %p631_p4 = scmp.ne.s32.totalorder %s130_s20, %s630_s9  ;;  %s634_s18 = sshll.u32 %s752_s16, 4  ;;  %s635_s18 = int_to_ptr.vmem [resolvable:$false] %s634_s18 }
  0x3a   : > { %s636_s21 = scalar_lea.vmem %s635_s18, 6400  ;;  %p637_p2 = scmp.lt.s32.totalorder %s130_s20, %s635_s18 }
  0x3b   : > { %p632_p6 = pnand %p631_p4, %p520_p5  ;;  %p638_p1 = scmp.lt.s32.totalorder %s636_s21, %s630_s9 }
  0x3d   : > { %p633_p7 = pneg %p632_p6  ;;  %p639_p8 = por %p638_p1, %p637_p2 }
  0x3f   : > { %p640_p10 = pnand %p639_p8, %p633_p7 }
  0x41   : > { %643 = shalt.err (!%p640_p10)
}
  0x42   : > { %132 = dma.hbm_to_vmem [thread:$0]  (%p520_p5), %s870_s24, %s859_s5, %s130_s20, %s862_s15  }
  0x43 PF: > { %p524_p9 = scmp.ge.s32.totalorder %s750_s14, 1  ;;  %p134_p11 = scmp.lt.s32.totalorder %s750_s14, 6 }
  0x45   : > { %p135_p12 = pnand %p524_p9, %p134_p11 }
  0x46   : > { %s140_s23 = sand.u32 (!%p135_p12), 1, %s734_s10   ;;  %p1169_p8 = scmp.ne.s32.totalorder (!%p135_p12), %s1166_s22, 0 }
  0x47   : > { %138 = sbr.rel (%p135_p12) target bundleno = 172 (0xac), region = 24  ;;  %s141_s30 = scalar_lea.sflag (!%p135_p12), [#allocation3], %s140_s23 }
  0x48   : > { %s533_s25 = smul.u32 (!%p135_p12), 200, %s140_s23 }
  0x4a   : > { %s896_s2 = scalar_lea.vmem (!%p135_p12), [#allocation2], %s533_s25 }
  0x4e   : > { %709 = dma.done.wait (%p1169_p8), %s141_s30, 3200  }
  0x4f   : > { %711 = vsyncadd (%p1169_p8), %s141_s30, 4294964096  ;;  %s160_s5 = sand.u32 1, %s722_s7   ;;  %s904_s15 = smul.u32 3200, %s742_s12 }
  0x50   : > { %s534_s20 = smul.u32 200, %s160_s5 }
  0x51   : > { %s172_s24 = sadd.s32 3200, %s904_s15 }
  0x52   : > { %s909_s19 = scalar_lea.vmem [#allocation5], %s534_s20  ;;  %p911_p1 = scmp.gt.s32.totalorder %s172_s24, 5000 }
  0x53   : > { %v177_v0 = vld [vmem:[%s896_s2] sm:$0xff] (!%p911_p1)  ;;  %v178_v1 = vld [vmem:[%s896_s2 + $0x8] sm:$0xff] (!%p911_p1)  ;;  %v179_v2 = vld [vmem:[%s896_s2 + $0x10] sm:$0xff] (!%p911_p1) }
  0x54   : > { %176 = sbr.rel (%p911_p1) target bundleno = 97 (0x61), region = 32  ;;  %202 = vst [vmem:[%s909_s19] sm:$0xff] (!%p911_p1), %v177_v0  ;;  %203 = vst [vmem:[%s909_s19 + $0x8] sm:$0xff] (!%p911_p1), %v178_v1  ;;  %v180_v3 = vld [vmem:[%s896_s2 + $0x18] sm:$0xff] (!%p911_p1)  ;;  %v181_v4 = vld [vmem:[%s896_s2 + $0x20] sm:$0xff] (!%p911_p1) }
  0x55   : > { %204 = vst [vmem:[%s909_s19 + $0x10] sm:$0xff] (!%p911_p1), %v179_v2  ;;  %v182_v5 = vld [vmem:[%s896_s2 + $0x28] sm:$0xff] (!%p911_p1)  ;;  %205 = vst [vmem:[%s909_s19 + $0x18] sm:$0xff] (!%p911_p1), %v180_v3  ;;  %v183_v6 = vld [vmem:[%s896_s2 + $0x30] sm:$0xff] (!%p911_p1) }
  0x56   : > { %206 = vst [vmem:[%s909_s19 + $0x20] sm:$0xff] (!%p911_p1), %v181_v4  ;;  %207 = vst [vmem:[%s909_s19 + $0x28] sm:$0xff] (!%p911_p1), %v182_v5  ;;  %v184_v7 = vld [vmem:[%s896_s2 + $0x38] sm:$0xff] (!%p911_p1)  ;;  %v185_v8 = vld [vmem:[%s896_s2 + $0x40] sm:$0xff] (!%p911_p1) }
  0x57   : > { %208 = vst [vmem:[%s909_s19 + $0x30] sm:$0xff] (!%p911_p1), %v183_v6  ;;  %209 = vst [vmem:[%s909_s19 + $0x38] sm:$0xff] (!%p911_p1), %v184_v7  ;;  %v186_v9 = vld [vmem:[%s896_s2 + $0x48] sm:$0xff] (!%p911_p1)  ;;  %v187_v10 = vld [vmem:[%s896_s2 + $0x50] sm:$0xff] (!%p911_p1) }
  0x58   : > { %210 = vst [vmem:[%s909_s19 + $0x40] sm:$0xff] (!%p911_p1), %v185_v8  ;;  %v188_v11 = vld [vmem:[%s896_s2 + $0x58] sm:$0xff] (!%p911_p1)  ;;  %211 = vst [vmem:[%s909_s19 + $0x48] sm:$0xff] (!%p911_p1), %v186_v9  ;;  %v189_v12 = vld [vmem:[%s896_s2 + $0x60] sm:$0xff] (!%p911_p1) }
  0x59   : > { %212 = vst [vmem:[%s909_s19 + $0x50] sm:$0xff] (!%p911_p1), %v187_v10  ;;  %213 = vst [vmem:[%s909_s19 + $0x58] sm:$0xff] (!%p911_p1), %v188_v11  ;;  %v190_v13 = vld [vmem:[%s896_s2 + $0x68] sm:$0xff] (!%p911_p1)  ;;  %v191_v14 = vld [vmem:[%s896_s2 + $0x70] sm:$0xff] (!%p911_p1) }
  0x5a   : > { %214 = vst [vmem:[%s909_s19 + $0x60] sm:$0xff] (!%p911_p1), %v189_v12  ;;  %215 = vst [vmem:[%s909_s19 + $0x68] sm:$0xff] (!%p911_p1), %v190_v13  ;;  %v192_v15 = vld [vmem:[%s896_s2 + $0x78] sm:$0xff] (!%p911_p1)  ;;  %v193_v16 = vld [vmem:[%s896_s2 + $0x80] sm:$0xff] (!%p911_p1) }
  0x5b   : > { %216 = vst [vmem:[%s909_s19 + $0x70] sm:$0xff] %v191_v14  ;;  %v194_v17 = vld [vmem:[%s896_s2 + $0x88] sm:$0xff]  ;;  %217 = vst [vmem:[%s909_s19 + $0x78] sm:$0xff] %v192_v15  ;;  %v195_v18 = vld [vmem:[%s896_s2 + $0x90] sm:$0xff] }
  0x5c   : > { %218 = vst [vmem:[%s909_s19 + $0x80] sm:$0xff] %v193_v16  ;;  %219 = vst [vmem:[%s909_s19 + $0x88] sm:$0xff] %v194_v17  ;;  %v196_v19 = vld [vmem:[%s896_s2 + $0x98] sm:$0xff]  ;;  %v197_v20 = vld [vmem:[%s896_s2 + $0xa0] sm:$0xff] }
  0x5d   : > { %220 = vst [vmem:[%s909_s19 + $0x90] sm:$0xff] %v195_v18  ;;  %221 = vst [vmem:[%s909_s19 + $0x98] sm:$0xff] %v196_v19  ;;  %v198_v21 = vld [vmem:[%s896_s2 + $0xa8] sm:$0xff]  ;;  %v199_v22 = vld [vmem:[%s896_s2 + $0xb0] sm:$0xff] }
  0x5e   : > { %222 = vst [vmem:[%s909_s19 + $0xa0] sm:$0xff] %v197_v20  ;;  %v200_v23 = vld [vmem:[%s896_s2 + $0xb8] sm:$0xff]  ;;  %223 = vst [vmem:[%s909_s19 + $0xa8] sm:$0xff] %v198_v21  ;;  %v201_v24 = vld [vmem:[%s896_s2 + $0xc0] sm:$0xff] }
  0x5f   : > { %224 = vst [vmem:[%s909_s19 + $0xb0] sm:$0xff] %v199_v22  ;;  %225 = vst [vmem:[%s909_s19 + $0xb8] sm:$0xff] %v200_v23 }
  0x60   : > { %226 = vst [vmem:[%s909_s19 + $0xc0] sm:$0xff] %v201_v24 }
  0x61 PF: > { %p526_p2 = scmp.lt.s32.totalorder %s904_s15, 5000 }
  0x62   : > { %v753_v25 = vmov (!%p526_p2), 0.0  }
  0x63   : > { %230 = sbr.rel (%p526_p2) target bundleno = 112 (0x70), region = 36  ;;  %231 = vst [vmem:[%s909_s19] sm:$0xff] (!%p526_p2), %v753_v25  ;;  %232 = vst [vmem:[%s909_s19 + $0x8] sm:$0xff] (!%p526_p2), %v753_v25 }
  0x64   : > { %233 = vst [vmem:[%s909_s19 + $0x10] sm:$0xff] (!%p526_p2), %v753_v25  ;;  %234 = vst [vmem:[%s909_s19 + $0x18] sm:$0xff] (!%p526_p2), %v753_v25 }
  0x65   : > { %235 = vst [vmem:[%s909_s19 + $0x20] sm:$0xff] (!%p526_p2), %v753_v25  ;;  %236 = vst [vmem:[%s909_s19 + $0x28] sm:$0xff] (!%p526_p2), %v753_v25 }
  0x66   : > { %237 = vst [vmem:[%s909_s19 + $0x30] sm:$0xff] (!%p526_p2), %v753_v25  ;;  %238 = vst [vmem:[%s909_s19 + $0x38] sm:$0xff] (!%p526_p2), %v753_v25 }
  0x67   : > { %239 = vst [vmem:[%s909_s19 + $0x40] sm:$0xff] (!%p526_p2), %v753_v25  ;;  %240 = vst [vmem:[%s909_s19 + $0x48] sm:$0xff] (!%p526_p2), %v753_v25 }
  0x68   : > { %241 = vst [vmem:[%s909_s19 + $0x50] sm:$0xff] (!%p526_p2), %v753_v25  ;;  %242 = vst [vmem:[%s909_s19 + $0x58] sm:$0xff] (!%p526_p2), %v753_v25 }
  0x69   : > { %243 = vst [vmem:[%s909_s19 + $0x60] sm:$0xff] (!%p526_p2), %v753_v25  ;;  %244 = vst [vmem:[%s909_s19 + $0x68] sm:$0xff] (!%p526_p2), %v753_v25 }
  0x6a   : > { %245 = vst [vmem:[%s909_s19 + $0x70] sm:$0xff] %v753_v25  ;;  %246 = vst [vmem:[%s909_s19 + $0x78] sm:$0xff] %v753_v25 }
  0x6b   : > { %247 = vst [vmem:[%s909_s19 + $0x80] sm:$0xff] %v753_v25  ;;  %248 = vst [vmem:[%s909_s19 + $0x88] sm:$0xff] %v753_v25 }
  0x6c   : > { %249 = vst [vmem:[%s909_s19 + $0x90] sm:$0xff] %v753_v25  ;;  %250 = vst [vmem:[%s909_s19 + $0x98] sm:$0xff] %v753_v25 }
  0x6d   : > { %251 = vst [vmem:[%s909_s19 + $0xa0] sm:$0xff] %v753_v25  ;;  %252 = vst [vmem:[%s909_s19 + $0xa8] sm:$0xff] %v753_v25 }
  0x6e   : > { %253 = vst [vmem:[%s909_s19 + $0xb0] sm:$0xff] %v753_v25  ;;  %254 = vst [vmem:[%s909_s19 + $0xb8] sm:$0xff] %v753_v25 }
  0x6f   : > { %255 = vst [vmem:[%s909_s19 + $0xc0] sm:$0xff] %v753_v25 }
  0x70 PF: > { %p258_p5 = pnand %p526_p2, %p911_p1 }
  0x71   : > { %v262_v26 = vlaneseq (!%p258_p5)  ;;  %v1000_v27 = vstv (!%p258_p5), %s904_s15  ;;  %v339_v30 = vld [vmem:[%s896_s2] sm:$0xff] (!%p258_p5)  ;;  %v340_v39 = vld [vmem:[%s896_s2 + $0x8] sm:$0xff] (!%p258_p5)  ;;  %v341_v41 = vld [vmem:[%s896_s2 + $0x10] sm:$0xff] (!%p258_p5) }
  0x72   : > { %261 = sbr.rel (%p258_p5) target bundleno = 147 (0x93), region = 40  ;;  %v342_v43 = vld [vmem:[%s896_s2 + $0x18] sm:$0xff] (!%p258_p5)  ;;  %v343_v46 = vld [vmem:[%s896_s2 + $0x20] sm:$0xff] (!%p258_p5)  ;;  %v344_v49 = vld [vmem:[%s896_s2 + $0x28] sm:$0xff] (!%p258_p5) }
  0x73   : > { %v1002_v28 = vand.u32 (!%p258_p5), 127, %v262_v26  ;;  %v345_v50 = vld [vmem:[%s896_s2 + $0x30] sm:$0xff] (!%p258_p5)  ;;  %v346_v52 = vld [vmem:[%s896_s2 + $0x38] sm:$0xff] (!%p258_p5)  ;;  %v347_v2 = vld [vmem:[%s896_s2 + $0x40] sm:$0xff] (!%p258_p5) }
  0x74   : > { %v348_v7 = vld [vmem:[%s896_s2 + $0x48] sm:$0xff] (!%p258_p5)  ;;  %v349_v9 = vld [vmem:[%s896_s2 + $0x50] sm:$0xff] (!%p258_p5)  ;;  %v350_v11 = vld [vmem:[%s896_s2 + $0x58] sm:$0xff] (!%p258_p5) }
  0x75   : > { %v289_v29 = vadd.s32 (!%p258_p5), %v1000_v27, %v1002_v28  ;;  %v264_v31 = vadd.s32 (!%p258_p5), 128, %v1002_v28  ;;  %v265_v32 = vadd.s32 (!%p258_p5), 256, %v1002_v28  ;;  %v266_v33 = vadd.s32 (!%p258_p5), 384, %v1002_v28  ;;  %v351_v13 = vld [vmem:[%s896_s2 + $0x60] sm:$0xff] (!%p258_p5)  ;;  %v352_v15 = vld [vmem:[%s896_s2 + $0x68] sm:$0xff] (!%p258_p5)  ;;  %v353_v19 = vld [vmem:[%s896_s2 + $0x70] sm:$0xff] (!%p258_p5) }
  0x76   : > { %v267_v34 = vadd.s32 (!%p258_p5), 512, %v1002_v28  ;;  %v268_v35 = vadd.s32 (!%p258_p5), 640, %v1002_v28  ;;  %v269_v36 = vadd.s32 (!%p258_p5), 768, %v1002_v28  ;;  %v270_v37 = vadd.s32 (!%p258_p5), 896, %v1002_v28  ;;  %v354_v20 = vld [vmem:[%s896_s2 + $0x78] sm:$0xff] (!%p258_p5) }
  0x77   : > { %vm314_vm0 = vcmp.lt.s32.totalorder (!%p258_p5), %v289_v29, 5000  ;;  %v290_v38 = vadd.s32 (!%p258_p5), %v1000_v27, %v264_v31  ;;  %v291_v40 = vadd.s32 (!%p258_p5), %v1000_v27, %v265_v32  ;;  %v292_v42 = vadd.s32 (!%p258_p5), %v1000_v27, %v266_v33 }
  0x78   : > { %v364_v44 = vsel (!%p258_p5), %vm314_vm0, %v339_v30, 0.0  ;;  %v293_v45 = vadd.s32 (!%p258_p5), %v1000_v27, %v267_v34  ;;  %v294_v47 = vadd.s32 (!%p258_p5), %v1000_v27, %v268_v35  ;;  %v295_v48 = vadd.s32 (!%p258_p5), %v1000_v27, %v269_v36  ;;  %v355_v36 = vld [vmem:[%s896_s2 + $0x80] sm:$0xff] (!%p258_p5) }
  0x79   : > { %389 = vst [vmem:[%s909_s19] sm:$0xff] %v364_v44  ;;  %vm315_vm1 = vcmp.lt.s32.totalorder %v290_v38, 5000  ;;  %vm316_vm2 = vcmp.lt.s32.totalorder %v291_v40, 5000  ;;  %vm317_vm3 = vcmp.lt.s32.totalorder %v292_v42, 5000  ;;  %v296_v51 = vadd.s32 %v1000_v27, %v270_v37 }
  0x7a   : > { %v365_v53 = vsel %vm315_vm1, %v340_v39, 0.0  ;;  %v366_v54 = vsel %vm316_vm2, %v341_v41, 0.0  ;;  %v367_v55 = vsel %vm317_vm3, %v342_v43, 0.0  ;;  %vm318_vm4 = vcmp.lt.s32.totalorder %v293_v45, 5000  ;;  %v356_v41 = vld [vmem:[%s896_s2 + $0x88] sm:$0xff]  ;;  %v357_v43 = vld [vmem:[%s896_s2 + $0x90] sm:$0xff] }
  0x7b   : > { %390 = vst [vmem:[%s909_s19 + $0x8] sm:$0xff] %v365_v53  ;;  %391 = vst [vmem:[%s909_s19 + $0x10] sm:$0xff] %v366_v54  ;;  %v368_v56 = vsel %vm318_vm4, %v343_v46, 0.0  ;;  %vm319_vm5 = vcmp.lt.s32.totalorder %v294_v47, 5000  ;;  %vm320_vm6 = vcmp.lt.s32.totalorder %v295_v48, 5000  ;;  %vm321_vm7 = vcmp.lt.s32.totalorder %v296_v51, 5000 }
  0x7c   : > { %392 = vst [vmem:[%s909_s19 + $0x18] sm:$0xff] %v367_v55  ;;  %393 = vst [vmem:[%s909_s19 + $0x20] sm:$0xff] %v368_v56  ;;  %v369_v57 = vsel %vm319_vm5, %v344_v49, 0.0  ;;  %v370_v58 = vsel %vm320_vm6, %v345_v50, 0.0  ;;  %v371_v59 = vsel %vm321_vm7, %v346_v52, 0.0  ;;  %v271_v60 = vadd.s32 1024, %v1002_v28 }
  0x7d   : > { %394 = vst [vmem:[%s909_s19 + $0x28] sm:$0xff] %v369_v57  ;;  %395 = vst [vmem:[%s909_s19 + $0x30] sm:$0xff] %v370_v58  ;;  %v272_v61 = vadd.s32 1152, %v1002_v28  ;;  %v273_v62 = vadd.s32 1280, %v1002_v28  ;;  %v274_v63 = vadd.s32 1408, %v1002_v28  ;;  %v275_v0 = vadd.s32 1536, %v1002_v28 }
  0x7e   : > { %396 = vst [vmem:[%s909_s19 + $0x38] sm:$0xff] %v371_v59  ;;  %v297_v1 = vadd.s32 %v1000_v27, %v271_v60  ;;  %v276_v3 = vadd.s32 1664, %v1002_v28  ;;  %v277_v4 = vadd.s32 1792, %v1002_v28  ;;  %v278_v5 = vadd.s32 1920, %v1002_v28  ;;  %v358_v45 = vld [vmem:[%s896_s2 + $0x98] sm:$0xff]  ;;  %v359_v47 = vld [vmem:[%s896_s2 + $0xa0] sm:$0xff] }
  0x7f   : > { %v298_v6 = vadd.s32 %v1000_v27, %v272_v61  ;;  %v299_v8 = vadd.s32 %v1000_v27, %v273_v62  ;;  %v300_v10 = vadd.s32 %v1000_v27, %v274_v63  ;;  %v301_v12 = vadd.s32 %v1000_v27, %v275_v0  ;;  %v360_v49 = vld [vmem:[%s896_s2 + $0xa8] sm:$0xff]  ;;  %v361_v53 = vld [vmem:[%s896_s2 + $0xb0] sm:$0xff]  ;;  %v362_v54 = vld [vmem:[%s896_s2 + $0xb8] sm:$0xff] }
  0x80   : > { %vm322_vm8 = vcmp.lt.s32.totalorder %v297_v1, 5000  ;;  %v302_v14 = vadd.s32 %v1000_v27, %v276_v3  ;;  %v303_v16 = vadd.s32 %v1000_v27, %v277_v4  ;;  %v304_v17 = vadd.s32 %v1000_v27, %v278_v5  ;;  %v363_v0 = vld [vmem:[%s896_s2 + $0xc0] sm:$0xff] }
  0x81   : > { %v372_v18 = vsel %vm322_vm8, %v347_v2, 0.0  ;;  %vm323_vm9 = vcmp.lt.s32.totalorder %v298_v6, 5000  ;;  %vm324_vm10 = vcmp.lt.s32.totalorder %v299_v8, 5000  ;;  %vm325_vm11 = vcmp.lt.s32.totalorder %v300_v10, 5000 }
  0x82   : > { %397 = vst [vmem:[%s909_s19 + $0x40] sm:$0xff] %v372_v18  ;;  %v373_v21 = vsel %vm323_vm9, %v348_v7, 0.0  ;;  %v374_v22 = vsel %vm324_vm10, %v349_v9, 0.0  ;;  %v375_v23 = vsel %vm325_vm11, %v350_v11, 0.0  ;;  %vm326_vm12 = vcmp.lt.s32.totalorder %v301_v12, 5000 }
  0x83   : > { %398 = vst [vmem:[%s909_s19 + $0x48] sm:$0xff] %v373_v21  ;;  %399 = vst [vmem:[%s909_s19 + $0x50] sm:$0xff] %v374_v22  ;;  %v376_v24 = vsel %vm326_vm12, %v351_v13, 0.0  ;;  %vm327_vm13 = vcmp.lt.s32.totalorder %v302_v14, 5000  ;;  %vm328_vm14 = vcmp.lt.s32.totalorder %v303_v16, 5000  ;;  %vm329_vm15 = vcmp.lt.s32.totalorder %v304_v17, 5000 }
  0x84   : > { %400 = vst [vmem:[%s909_s19 + $0x58] sm:$0xff] %v375_v23  ;;  %401 = vst [vmem:[%s909_s19 + $0x60] sm:$0xff] %v376_v24  ;;  %v377_v25 = vsel %vm327_vm13, %v352_v15, 0.0  ;;  %v378_v26 = vsel %vm328_vm14, %v353_v19, 0.0  ;;  %v379_v29 = vsel %vm329_vm15, %v354_v20, 0.0  ;;  %v279_v30 = vadd.s32 2048, %v1002_v28 }
  0x85   : > { %402 = vst [vmem:[%s909_s19 + $0x68] sm:$0xff] %v377_v25  ;;  %403 = vst [vmem:[%s909_s19 + $0x70] sm:$0xff] %v378_v26  ;;  %v280_v31 = vadd.s32 2176, %v1002_v28  ;;  %v281_v32 = vadd.s32 2304, %v1002_v28  ;;  %v282_v33 = vadd.s32 2432, %v1002_v28  ;;  %v283_v34 = vadd.s32 2560, %v1002_v28 }
  0x86   : > { %404 = vst [vmem:[%s909_s19 + $0x78] sm:$0xff] %v379_v29  ;;  %v305_v35 = vadd.s32 %v1000_v27, %v279_v30  ;;  %v284_v37 = vadd.s32 2688, %v1002_v28  ;;  %v285_v38 = vadd.s32 2816, %v1002_v28  ;;  %v286_v39 = vadd.s32 2944, %v1002_v28 }
  0x87   : > { %v306_v40 = vadd.s32 %v1000_v27, %v280_v31  ;;  %v307_v42 = vadd.s32 %v1000_v27, %v281_v32  ;;  %v308_v44 = vadd.s32 %v1000_v27, %v282_v33  ;;  %v309_v46 = vadd.s32 %v1000_v27, %v283_v34 }
  0x88   : > { %vm330_vm0 = vcmp.lt.s32.totalorder %v305_v35, 5000  ;;  %v310_v48 = vadd.s32 %v1000_v27, %v284_v37  ;;  %v311_v50 = vadd.s32 %v1000_v27, %v285_v38  ;;  %v312_v51 = vadd.s32 %v1000_v27, %v286_v39 }
  0x89   : > { %v380_v52 = vsel %vm330_vm0, %v355_v36, 0.0  ;;  %vm331_vm1 = vcmp.lt.s32.totalorder %v306_v40, 5000  ;;  %vm332_vm2 = vcmp.lt.s32.totalorder %v307_v42, 5000  ;;  %vm333_vm3 = vcmp.lt.s32.totalorder %v308_v44, 5000 }
  0x8a   : > { %405 = vst [vmem:[%s909_s19 + $0x80] sm:$0xff] %v380_v52  ;;  %v381_v55 = vsel %vm331_vm1, %v356_v41, 0.0  ;;  %v382_v56 = vsel %vm332_vm2, %v357_v43, 0.0  ;;  %v383_v57 = vsel %vm333_vm3, %v358_v45, 0.0  ;;  %vm334_vm4 = vcmp.lt.s32.totalorder %v309_v46, 5000 }
  0x8b   : > { %406 = vst [vmem:[%s909_s19 + $0x88] sm:$0xff] %v381_v55  ;;  %407 = vst [vmem:[%s909_s19 + $0x90] sm:$0xff] %v382_v56  ;;  %v384_v58 = vsel %vm334_vm4, %v359_v47, 0.0  ;;  %vm335_vm5 = vcmp.lt.s32.totalorder %v310_v48, 5000  ;;  %vm336_vm6 = vcmp.lt.s32.totalorder %v311_v50, 5000  ;;  %vm337_vm7 = vcmp.lt.s32.totalorder %v312_v51, 5000 }
  0x8c   : > { %408 = vst [vmem:[%s909_s19 + $0x98] sm:$0xff] %v383_v57  ;;  %409 = vst [vmem:[%s909_s19 + $0xa0] sm:$0xff] %v384_v58  ;;  %v385_v59 = vsel %vm335_vm5, %v360_v49, 0.0  ;;  %v386_v60 = vsel %vm336_vm6, %v361_v53, 0.0  ;;  %v387_v61 = vsel %vm337_vm7, %v362_v54, 0.0  ;;  %v287_v62 = vadd.s32 3072, %v1002_v28 }
  0x8d   : > { %410 = vst [vmem:[%s909_s19 + $0xa8] sm:$0xff] %v385_v59  ;;  %411 = vst [vmem:[%s909_s19 + $0xb0] sm:$0xff] %v386_v60 }
  0x8e   : > { %412 = vst [vmem:[%s909_s19 + $0xb8] sm:$0xff] %v387_v61  ;;  %v313_v63 = vadd.s32 %v1000_v27, %v287_v62 }
  0x90   : > { %vm338_vm8 = vcmp.lt.s32.totalorder %v313_v63, 5000 }
  0x91   : > { %v388_v1 = vsel %vm338_vm8, %v363_v0, 0.0 }
  0x92   : > { %413 = vst [vmem:[%s909_s19 + $0xc0] sm:$0xff] %v388_v1 }
  0x93 PF: > { %s1108_s4 = scalar_lea.hbm %s1162_s1, %s904_s15  ;;  %s431_s9 = sshll.u32 %s909_s19, 4  ;;  %s432_s9 = int_to_ptr.vmem [resolvable:$true] %s431_s9 }
  0x94   : > { %s415_s16 = scalar_lea.sflag [#allocation4], %s160_s5  ;;  %s644_s18 = scalar_lea.vmem %s432_s9, 3200 }
  0x95   : > { %p645_p13 = scmp.ne.s32.totalorder %s432_s9, %s644_s18  ;;  %p1171_p0 = scmp.ne.s32.totalorder %s1167_s28, 0 }
  0x96   : > { %s754_s21 = smov [#allocation5]  }
  0x97   : > { %p646_p3 = pnand %p645_p13, %p1171_p0  ;;  %s648_s23 = sshll.u32 %s754_s21, 4  ;;  %s649_s23 = int_to_ptr.vmem [resolvable:$false] %s648_s23 }
  0x98   : > { %s650_s25 = scalar_lea.vmem %s649_s23, 6400  ;;  %p651_p6 = scmp.lt.s32.totalorder %s432_s9, %s649_s23 }
  0x99   : > { %p647_p4 = pneg %p646_p3  ;;  %p652_p7 = scmp.lt.s32.totalorder %s650_s25, %s644_s18 }
  0x9b   : > { %p653_p10 = por %p652_p7, %p651_p6 }
  0x9d   : > { %p654_p9 = pnand %p653_p10, %p647_p4 }
  0x9f   : > { %657 = shalt.err (!%p654_p9)
}
  0xa0   : > { %s658_s30 = scalar_lea.hbm %s1108_s4, 3200  ;;  %s662_s15 = scalar_lea.hbm %s1162_s1, 16000 }
  0xa1   : > { %p659_p11 = scmp.ne.s32.totalorder %s1108_s4, %s658_s30  ;;  %p663_p1 = scmp.lt.u32.totalorder %s1108_s4, %s1162_s1 }
  0xa2   : > { %p664_p2 = scmp.lt.u32.totalorder %s662_s15, %s658_s30  ;;  %p666_p13 = scmp.lt.u32.totalorder %s658_s30, %s1108_s4 }
  0xa3   : > { %p660_p12 = pnand %p659_p11, %p1171_p0 }
  0xa4   : > { %p665_p5 = por %p664_p2, %p663_p1 }
  0xa5   : > { %p661_p8 = pneg %p660_p12 }
  0xa6   : > { %p667_p3 = por %p666_p13, %p665_p5 }
  0xa8   : > { %p668_p4 = pnand %p667_p3, %p661_p8 }
  0xaa   : > { %671 = shalt.err (!%p668_p4)
}
  0xab   : > { %536 = dma.vmem_to_hbm [thread:$0]  (%p1171_p0), %s432_s9, 3200, %s1108_s4, %s415_s16  }
  0xac PF: > { %p542_p6 = scmp.ge.s32.totalorder %s750_s14, 2  ;;  %s443_s19 = sand.u32 1, %s718_s6  }
  0xad   : > { %p1172_p7 = scmp.ne.s32.totalorder %s1168_s29, 0  ;;  %s444_s3 = scalar_lea.sflag [#allocation4], %s443_s19 }
  0xaf   : > { %p539_p10 = pnand %p542_p6, %p1172_p7 }
  0xb1   : > { %713 = dma.done.wait (!%p539_p10), %s444_s3, 3200  }
  0xb2   : > { %715 = vsyncadd (!%p539_p10), %s444_s3, 4294964096  ;;  %s17_s14 = sadd.s32 1, %s750_s14   ;;  %s1173_s6 = smov %s722_s7 }
  0xb3   : > { %p14_p9 = scmp.ge.s32.totalorder %s17_s14, 7   ;;  %s1174_s7 = smov %s726_s8 }
  0xb4   : > { %s1175_s8 = smov %s837_s26  ;;  %s1176_s9 = smov %s734_s10 }
  0xb5   : > { %s1177_s10 = smov %s738_s11  ;;  %s1178_s11 = smov %s840_s27 }
  0xb6   : > { %s1179_s12 = smov %s746_s13  ;;  %s1180_s13 = smov %s1182_s17 }
  0xb7   :  { %16 = sbr.rel (!%p14_p9) target bundleno = 8 (0x8), region = 81 }
  0xbe   :  { %449 = vsyncpa [#allocation3], 1 }
  0xbf   :  { %451 = vsyncpa [#allocation3 + $0x1], 1 }
  0xc0   :  { %452 = vsyncpa [#allocation4], 1 }
  0xc1   :  { %454 = vsyncpa [#allocation4 + $0x1], 1 }

</bundles_post_ra>
